<compile_context>
chip_gen: v7x
topology: tpu7x:2x2x1
jax: 0.10.0
libtpu: 0.0.40
codegen_flags: <defaults>
</compile_context>

<pallas_src>
import jax
import jax.numpy as jnp
from jax.experimental import pallas as pl
from jax.experimental.pallas import tpu as pltpu


def _round_up(x, m):
    return ((x + m - 1) // m) * m


def _vmem_limit(bytes_needed):
    # >= default scoped limit, <= 48 MiB so it is always safe on v7x (64 MiB/TC).
    return int(min(48 * 1024 * 1024, max(32 * 1024 * 1024, 2 * bytes_needed)))


def linear_kernel(x_ref, w_ref, b_ref, o_ref):
    # x_ref: (tm, K) f32, w_ref: (K, N) f32|bf16, b_ref: (1, N) f32, o_ref: (tm, N) f32
    xv = x_ref[...]
    wv = w_ref[...]
    if wv.dtype != xv.dtype:
        # bf16 fast path: cast the activation tile so the MXU runs native bf16;
        # the f32 accumulate below preserves the reduction precision.
        xv = xv.astype(wv.dtype)
    acc = jnp.dot(xv, wv, preferred_element_type=jnp.float32)
    o_ref[...] = (acc + b_ref[...]).astype(o_ref.dtype)


def prepare_params(w, b, *, use_bf16=False):
    """Pad the torch-layout (C_out, C_in) weight / (C_out,) bias ONCE.

    Done outside the per-call hot path so the kernel never re-reads/re-writes
    the weight through HBM just to pad it. Only the output/lane dim is padded
    to 128 (lane-dense stores); K stays at C_in (no padded x copies needed).
    """
    C_out, C_in = w.shape
    N = _round_up(C_out, 128)
    w_dtype = jnp.bfloat16 if use_bf16 else w.dtype
    w_t = jnp.zeros((C_in, N), w_dtype).at[:, :C_out].set(w.T.astype(w_dtype))
    b_p = jnp.zeros((1, N), jnp.float32).at[0, :C_out].set(b.astype(jnp.float32))
    return w_t, b_p, C_out


def dummy_model_forward(x, params, *, block_m=512):
    """y = x @ w.T + b  (torch nn.Linear forward). x: (B, C_in) f32."""
    w_t, b_p, C_out = params
    B, C_in = x.shape
    K, N = w_t.shape
    assert K == C_in, "weight/input channel mismatch"

    # Tile-count-first batch tiling (avoids ~2x padding for awkward B).
    n_tiles = pl.cdiv(B, block_m)
    if B >= 16:
        n_tiles = max(n_tiles, 2)  # v7x: give both TensorCores a grid step
    per_tile = pl.cdiv(B, n_tiles)
    tm = _round_up(per_tile, 8)    # f32 sublane multiple
    M = n_tiles * tm

    w_bytes = K * N * w_t.dtype.itemsize
    x_bytes = C_in * x.dtype.itemsize

    if n_tiles == 1:
        # Single-block fast path: whole arrays in VMEM, no grid, no pipeline.
        cost = pl.CostEstimate(
            flops=2 * B * C_in * N,
            transcendentals=0,
            bytes_accessed=B * x_bytes + w_bytes + 4 * N + 4 * B * N,
        )
        need = B * x_bytes + w_bytes + 4 * N + 4 * B * N
        out = pl.pallas_call(
            linear_kernel,
            out_shape=jax.ShapeDtypeStruct((B, N), jnp.float32),
            compiler_params=pltpu.CompilerParams(
                vmem_limit_bytes=_vmem_limit(need)),
            cost_estimate=cost,
        )(x, w_t, b_p)
        return out[:, :C_out]

    # Tiled / pipelined path over the batch dimension.
    if M == B:
        x_p = x                                   # no HBM copy needed
    else:
        x_p = jnp.zeros((M, C_in), x.dtype).at[:B].set(x)

    cost = pl.CostEstimate(
        flops=2 * M * C_in * N,
        transcendentals=0,
        bytes_accessed=M * x_bytes + w_bytes + 4 * N + 4 * M * N,
    )
    # x double-buffered, weight/bias single-buffered, output double-buffered.
    need = 2 * tm * x_bytes + w_bytes + 4 * N + 2 * tm * N * 4

    out = pl.pallas_call(
        linear_kernel,
        out_shape=jax.ShapeDtypeStruct((M, N), jnp.float32),
        grid=(n_tiles,),
        in_specs=[
            pl.BlockSpec((tm, C_in), lambda i: (i, 0)),            # x tile (streamed)
            pl.BlockSpec((K, N), lambda i: (0, 0),
                         pipeline_mode=pl.Buffered(1)),            # resident weight
            pl.BlockSpec((1, N), lambda i: (0, 0),
                         pipeline_mode=pl.Buffered(1)),            # resident bias
        ],
        out_specs=pl.BlockSpec((tm, N), lambda i: (i, 0)),
        compiler_params=pltpu.CompilerParams(
            dimension_semantics=("parallel",),                     # v7x: 2 TCs split batch
            vmem_limit_bytes=_vmem_limit(need),
        ),
        cost_estimate=cost,
    )(x_p, w_t, b_p)

    return out[:B, :C_out]


if __name__ == "__main__":
    in_channels = 120
    out_channels = 10

    key = jax.random.PRNGKey(0)
    kw, kb, kx1, kx2 = jax.random.split(key, 4)

    # Deterministic params mimicking nn.Linear's uniform(-1/sqrt(fan_in), 1/sqrt(fan_in)).
    bound = 1.0 / jnp.sqrt(jnp.float32(in_channels))
    w = jax.random.uniform(kw, (out_channels, in_channels), jnp.float32, -bound, bound)
    b = jax.random.uniform(kb, (out_channels,), jnp.float32, -bound, bound)

    # Pad/transpose the weight ONCE, outside the hot path.
    params = prepare_params(w, b)

    # 1) Tiny trainer-test shape: single-block fast path (no grid).
    x1 = jax.random.normal(kx1, (8, in_channels), jnp.float32)
    y1 = jax.block_until_ready(dummy_model_forward(x1, params))
    ref1 = x1 @ w.T + b
    assert y1.shape == (8, out_channels)
    assert jnp.allclose(y1, ref1, atol=1e-5, rtol=1e-5)

    # 2) Awkward batch: exercises the tiled/pipelined path + tile-count-first padding.
    x2 = jax.random.normal(kx2, (70, in_channels), jnp.float32)
    y2 = jax.block_until_ready(dummy_model_forward(x2, params, block_m=32))
    ref2 = x2 @ w.T + b
    assert y2.shape == (70, out_channels)
    assert jnp.allclose(y2, ref2, atol=1e-5, rtol=1e-5)

    print("KERNEL_OK")
</pallas_src>

<mosaic_0001>
module attributes {stable_mosaic.version = 11 : i64} {
  func.func @linear_kernel(%arg0: memref<8x120xf32, #tpu.memory_space<vmem>>, %arg1: memref<120x128xf32, #tpu.memory_space<vmem>>, %arg2: memref<1x128xf32, #tpu.memory_space<vmem>>, %arg3: memref<8x128xf32, #tpu.memory_space<vmem>>) attributes {dimension_semantics = [], scalar_prefetch = 0 : i64, scratch_operands = 0 : i64, tpu.core_type = #tpu.core_type<tc>} {
    %c0 = arith.constant 0 : index
    %c0_0 = arith.constant 0 : index
    %0 = vector.load %arg0[%c0, %c0_0] : memref<8x120xf32, #tpu.memory_space<vmem>>, vector<8x120xf32>
    %c0_1 = arith.constant 0 : index
    %c0_2 = arith.constant 0 : index
    %1 = vector.load %arg1[%c0_1, %c0_2] : memref<120x128xf32, #tpu.memory_space<vmem>>, vector<120x128xf32>
    %cst = arith.constant dense<0.000000e+00> : vector<8x128xf32>
    %2 = tpu.matmul %0, %1, %cst {dimension_numbers = #tpu.dot_dimension_numbers<[1], [0], [0], [1], [0, 0, 1, 1], [], []>} : vector<8x120xf32>, vector<120x128xf32>, vector<8x128xf32> -> vector<8x128xf32>
    %c0_3 = arith.constant 0 : index
    %c0_4 = arith.constant 0 : index
    %3 = vector.load %arg2[%c0_3, %c0_4] : memref<1x128xf32, #tpu.memory_space<vmem>>, vector<1x128xf32>
    %4 = vector.broadcast %3 : vector<1x128xf32> to vector<8x128xf32>
    %5 = arith.addf %2, %4 : vector<8x128xf32>
    %c0_5 = arith.constant 0 : index
    %c0_6 = arith.constant 0 : index
    %6 = vector.load %arg3[%c0_5, %c0_6] : memref<8x128xf32, #tpu.memory_space<vmem>>, vector<8x128xf32>
    tpu.vector_store %arg3[%c0_5, %c0_6], %5 {strides = array<i32>} : memref<8x128xf32, #tpu.memory_space<vmem>>, vector<8x128xf32>,
    return
  }
}

</mosaic_0001>

<bundles_post_ra>
// kernel: tpu_custom_call.1
= control target key start
LH: loop header
LB: loop body
LE: loop exit
PB: predicated region body
PF: predicated region fallthrough
CT: control target
= control target key end

     0   :  { %8 = vsyncpa [#allocation3], 0  ;;  %s381_s0 = inlined_call_operand.hbm [shape: f32[8,120], index: 0, kind: input, shape index: {}]   ;;  %s382_s1 = inlined_call_operand.hbm [shape: f32[120,128], index: 1, kind: input, shape index: {}]   ;;  %s383_s2 = inlined_call_operand.vmem [shape: f32[1,128], index: 2, kind: input, shape index: {}]   ;;  %s384_s3 = inlined_call_operand.hbm [shape: f32[8,128], index: 3, kind: output, shape index: {}]  }
   0x1   :  { %9 = vsyncpa [#allocation6], 0 }
   0x2   :  { %10 = vsyncpa [#allocation4], 0  ;;  %s307_s12 = smov [#allocation2]   ;;  %s308_s14 = smov [#allocation5]  }
   0x3   :  { %s17_s13 = sshll.u32 %s307_s12, 4  ;;  %s26_s15 = sshll.u32 %s308_s14, 4  ;;  %s18_s13 = int_to_ptr.vmem [resolvable:$true] %s17_s13  ;;  %s335_s15 = int_to_ptr.vmem [resolvable:$true] %s26_s15 }
   0x4   :  { %s235_s18 = scalar_lea.hbm %s381_s0, 128 }
   0x5   :  { %p236_p0 = scmp.ne.s32.totalorder %s381_s0, %s235_s18  ;;  %p239_p1 = scmp.lt.u32.totalorder %s235_s18, %s381_s0 }
   0x7   :  { %p241_p2 = pnand %p239_p1, %p236_p0 }
   0x9   :  { %244 = shalt.err (!%p241_p2)
}
   0xa   :  { %s245_s23 = scalar_lea.vmem %s18_s13, 128  ;;  %p250_p4 = scmp.lt.s32.totalorder %s18_s13, %s18_s13 }
   0xb   :  { %p246_p3 = scmp.ne.s32.totalorder %s18_s13, %s245_s23  ;;  %p251_p5 = scmp.lt.s32.totalorder %s245_s23, %s245_s23 }
   0xd   :  { %p252_p6 = por %p251_p5, %p250_p4 }
   0xf   :  { %p253_p7 = pnand %p252_p6, %p246_p3 }
  0x11   :  { %256 = shalt.err (!%p253_p7)
}
  0x12   :  { %20 = dma.hbm_to_vmem [thread:$0]  %s381_s0, 128, %s18_s13, [#allocation3]  }
  0x13   :  { %s257_s28 = scalar_lea.hbm %s382_s1, 1920 }
  0x14   :  { %p258_p8 = scmp.ne.s32.totalorder %s382_s1, %s257_s28  ;;  %p261_p9 = scmp.lt.u32.totalorder %s257_s28, %s382_s1 }
  0x16   :  { %p263_p10 = pnand %p261_p9, %p258_p8 }
  0x18   :  { %266 = shalt.err (!%p263_p10)
}
  0x19   :  { %s267_s6 = scalar_lea.vmem %s335_s15, 1920  ;;  %p272_p12 = scmp.lt.s32.totalorder %s335_s15, %s335_s15 }
  0x1a   :  { %p268_p11 = scmp.ne.s32.totalorder %s335_s15, %s267_s6  ;;  %p273_p13 = scmp.lt.s32.totalorder %s267_s6, %s267_s6 }
  0x1c   :  { %p274_p0 = por %p273_p13, %p272_p12 }
  0x1e   :  { %p275_p1 = pnand %p274_p0, %p268_p11 }
  0x20   :  { %278 = shalt.err (!%p275_p1)
}
  0x21   :  { %s309_s0 = smov 128   ;;  %s310_s7 = smov 8  }
  0x22   :  { %32 = dma.hbm_to_vmem [thread:$0]  %s382_s1, 1920, %s335_s15, [#allocation6], %s309_s0, %s309_s0, %s310_s7  }
  0x23   :  { %301 = dma.done.wait [#allocation3], 128  }
  0x24   :  { %302 = vsyncadd [#allocation3], 4294967168 }
  0x25   :  { %303 = dma.done.wait [#allocation6], 1920  }
  0x26   :  { %304 = vsyncadd [#allocation6], 4294965376  ;;  %v311_v0 = vmov 0.0|0.0   ;;  %vm312_vm0 = vmmov 0   ;;  %v313_v1 = vmov 0.0   ;;  %v42_v2 = vld [vmem:[#allocation5] sm:$0xff] }
  0x27   :  { %206 = vmatprep.subr.bf16.mxu0 %v311_v0  ;;  %203 = vmatprep.mubr.msk.f32.mxu0 %vm312_vm0, %v313_v1  ;;  %v43_v3 = vld [vmem:[#allocation5 + $0x8] sm:$0xff]  ;;  %v44_v4 = vld [vmem:[#allocation5 + $0x10] sm:$0xff]  ;;  %v45_v6 = vld [vmem:[#allocation5 + $0x18] sm:$0xff]  ;;  %vm64_vm1 = vcmask 982016   ;;  %s314_s11 = smov [#allocation7]  }
  0x28   :  { %v207_v5 = vpack.c.bf16 %v43_v3, %v42_v2  ;;  %v210_v7 = vpack.c.bf16 %v45_v6, %v44_v4  ;;  %v46_v8 = vld [vmem:[#allocation5 + $0x20] sm:$0xff]  ;;  %v47_v9 = vld [vmem:[#allocation5 + $0x28] sm:$0xff]  ;;  %v48_v11 = vld [vmem:[#allocation5 + $0x30] sm:$0xff]  ;;  %s145_s12 = sshll.u32 %s314_s11, 4  ;;  %s146_s12 = int_to_ptr.vmem [resolvable:$true] %s145_s12 }
  0x29   :  { %v213_v10 = vpack.c.bf16 %v47_v9, %v46_v8  ;;  %v49_v12 = vld [vmem:[#allocation5 + $0x38] sm:$0xff]  ;;  %v50_v14 = vld [vmem:[#allocation5 + $0x40] sm:$0xff]  ;;  %v51_v15 = vld [vmem:[#allocation5 + $0x48] sm:$0xff]  ;;  %s279_s13 = scalar_lea.vmem %s146_s12, 128  ;;  %p284_p3 = scmp.lt.s32.totalorder %s146_s12, %s146_s12 }
  0x2a   :  { %208 = vmatpush3.bf16.msra.mxu0 %v207_v5  ;;  %v216_v13 = vpack.c.bf16 %v49_v12, %v48_v11  ;;  %v219_v16 = vpack.c.bf16 %v51_v15, %v50_v14  ;;  %v52_v17 = vld [vmem:[#allocation5 + $0x50] sm:$0xff]  ;;  %v53_v18 = vld [vmem:[#allocation5 + $0x58] sm:$0xff]  ;;  %v54_v20 = vld [vmem:[#allocation5 + $0x60] sm:$0xff]  ;;  %p280_p2 = scmp.ne.s32.totalorder %s146_s12, %s279_s13  ;;  %p285_p4 = scmp.lt.s32.totalorder %s279_s13, %s279_s13 }
  0x2b   :  { %209 = vmatprep.subr.bf16.mxu0 %v311_v0  ;;  %v222_v19 = vpack.c.bf16 %v53_v18, %v52_v17  ;;  %v55_v21 = vld [vmem:[#allocation5 + $0x68] sm:$0xff]  ;;  %v56_v23 = vld [vmem:[#allocation5 + $0x70] sm:$0xff]  ;;  %v41_v24 = vld [vmem:[#allocation2] sm:$0xff] }
  0x2c   :  { %v225_v22 = vpack.c.bf16 %v55_v21, %v54_v20  ;;  %v155_v25 = vld [vmem:[%s383_s2] ss:$0 sm:$0xff]  ;;  %p286_p5 = por %p285_p4, %p284_p3 }
  0x2e   :  { %211 = vmatpush3.bf16.msra.mxu0 %v210_v7  ;;  %p287_p6 = pnand %p286_p5, %p280_p2 }
  0x2f   :  { %212 = vmatprep.subr.bf16.mxu0 %v311_v0 }
  0x32   :  { %214 = vmatpush3.bf16.msra.mxu0 %v213_v10 }
  0x33   :  { %215 = vmatprep.subr.bf16.mxu0 %v311_v0 }
  0x36   :  { %217 = vmatpush3.bf16.msra.mxu0 %v216_v13 }
  0x37   :  { %218 = vmatprep.subr.bf16.mxu0 %v311_v0 }
  0x3a   :  { %220 = vmatpush3.bf16.msra.mxu0 %v219_v16 }
  0x3b   :  { %221 = vmatprep.subr.bf16.mxu0 %v311_v0 }
  0x3e   :  { %223 = vmatpush3.bf16.msra.mxu0 %v222_v19 }
  0x3f   :  { %224 = vmatprep.subr.bf16.mxu0 %v311_v0 }
  0x42   :  { %226 = vmatpush3.bf16.msra.mxu0 %v225_v22 }
  0x43   :  { %201 = vmatprep.subr.mxu0 %v313_v1 }
  0x46   :  { %202 = vmatpush3.msra.mxu0 %v56_v23 }
  0x47   :  { %204 = vmatmul.mubr.msk.f32.vlgmr.msra.gmra.mrb[0].mxu0 %vm64_vm1, %v41_v24 }
 0x11a   :  { %v134_v26 = vpop.f32.mrb[0].mxu0 }
 0x11b   :  { %v135_v27 = vadd.f32 %v155_v25, %v134_v26  ;;  %v205_v28 = vpop.f32.mrb[1].mxu0 }
 0x11d   :  { %138 = vst [vmem:[#allocation7] sm:$0xff] %v135_v27 }
 0x11e   :  { %290 = shalt.err (!%p287_p6)
}
 0x11f   :  { %s291_s16 = scalar_lea.hbm %s384_s3, 128 }
 0x120   :  { %p292_p7 = scmp.ne.s32.totalorder %s384_s3, %s291_s16  ;;  %p295_p8 = scmp.lt.u32.totalorder %s291_s16, %s384_s3 }
 0x122   :  { %p297_p9 = pnand %p295_p8, %p292_p7 }
 0x124   :  { %300 = shalt.err (!%p297_p9)
}
 0x125   :  { %148 = dma.vmem_to_hbm [thread:$0]  %s146_s12, 128, %s384_s3, [#allocation4]  }
 0x126   :  { %305 = dma.done.wait [#allocation4], 128  }
 0x127   :  { %306 = vsyncadd [#allocation4], 4294967168 }
 0x128   :  { %152 = vsyncpa [#allocation3], 1 }
 0x129   :  { %153 = vsyncpa [#allocation6], 1 }
 0x12a   :  { %154 = vsyncpa [#allocation4], 1 }

</bundles_post_ra>
